<compile_context>
chip_gen: v7x
topology: tpu7x:2x2x1
jax: 0.10.0
libtpu: 0.0.40
codegen_flags: <defaults>
</compile_context>

<pallas_src>
import jax
import jax.numpy as jnp
from jax import lax
from jax.experimental import pallas as pl
from jax.experimental.pallas import tpu as pltpu


def _round_up(x: int, m: int) -> int:
    return ((x + m - 1) // m) * m


def _number_embedding_kernel(x_ref, w_ref, b_ref, o_ref):
    # x_ref: (tm, K)  w_ref: (N, K)  b_ref: (1, N)  o_ref: (tm, N)
    # Contract K (dim 1) of x against K (dim 1) of the PyTorch-layout weight:
    # equivalent to x @ W^T, accumulated in f32 on the MXU.
    y = lax.dot_general(
        x_ref[...], w_ref[...],
        dimension_numbers=(((1,), (1,)), ((), ())),
        preferred_element_type=jnp.float32,
    )
    y = y + b_ref[...]                       # broadcast bias over rows
    o_ref[...] = jnp.maximum(y, 0.0).astype(o_ref.dtype)


def number_embedding(x, weight, bias, *, tm=256):
    """ReLU(x @ weight.T + bias), matching nn.Linear + nn.ReLU.

    x:      (M, input_dim)            float32
    weight: (output_dim, input_dim)   PyTorch Linear convention (used as-is)
    bias:   (output_dim,)
    returns (M, output_dim)
    """
    M, K = x.shape
    N = weight.shape[0]
    assert weight.shape == (N, K)
    assert bias.shape == (N,)

    # Pick the row tile: as large as requested (default 256), but capped so
    # the grid has at least 2 steps when M allows (keeps both v7x TensorCores
    # busy). Keep it a multiple of 8 (f32 sublane).
    tm_eff = min(tm, max(_round_up(pl.cdiv(M, 2), 8), 8))

    # Pad the batch to a tile multiple (padded rows produce relu(bias) and are
    # sliced off below) so callers never have to shrink tm for awkward M.
    M_pad = _round_up(M, tm_eff)
    if M_pad != M:
        x_in = jnp.pad(x, ((0, M_pad - M), (0, 0)))
    else:
        x_in = x

    b2 = bias.reshape(1, N)

    out = pl.pallas_call(
        _number_embedding_kernel,
        out_shape=jax.ShapeDtypeStruct((M_pad, N), x.dtype),
        grid_spec=pltpu.PrefetchScalarGridSpec(
            num_scalar_prefetch=0,
            grid=(M_pad // tm_eff,),
            in_specs=[
                pl.BlockSpec((tm_eff, K), lambda i: (i, 0)),  # x row tile
                pl.BlockSpec((N, K), lambda i: (0, 0)),       # full weight (resident)
                pl.BlockSpec((1, N), lambda i: (0, 0)),       # bias (resident)
            ],
            out_specs=pl.BlockSpec((tm_eff, N), lambda i: (i, 0)),
        ),
        compiler_params=pltpu.CompilerParams(
            dimension_semantics=("parallel",)),
    )(x_in, weight, b2)

    if M_pad != M:
        out = out[:M]
    return out


if __name__ == "__main__":
    # Small shapes consistent with the module: input_dim=128, output_dim=128.
    # batch=12 deliberately not a multiple of 8 to exercise the padding path
    # and a 2-step grid.
    batch = 12
    input_dim = 128
    output_dim = 128

    key = jax.random.PRNGKey(0)
    kx, kw, kb = jax.random.split(key, 3)

    x = jax.random.normal(kx, (batch, input_dim), dtype=jnp.float32)
    # Deterministic init mimicking nn.Linear default (uniform +/- 1/sqrt(fan_in)).
    bound = 1.0 / (input_dim ** 0.5)
    weight = jax.random.uniform(
        kw, (output_dim, input_dim), dtype=jnp.float32, minval=-bound, maxval=bound)
    bias = jax.random.uniform(
        kb, (output_dim,), dtype=jnp.float32, minval=-bound, maxval=bound)

    out = number_embedding(x, weight, bias)
    out = jax.block_until_ready(out)

    # Reference check in plain JAX.
    ref = jnp.maximum(x @ weight.T + bias, 0.0)
    assert out.shape == (batch, output_dim)
    assert jnp.allclose(out, ref, atol=1e-5, rtol=1e-5)

    print("KERNEL_OK")
</pallas_src>

<mosaic_0001>
module attributes {stable_mosaic.version = 11 : i64} {
  func.func @_number_embedding_kernel(%arg0: i32, %arg1: memref<8x128xf32, #tpu.memory_space<vmem>>, %arg2: memref<128x128xf32, #tpu.memory_space<vmem>>, %arg3: memref<1x128xf32, #tpu.memory_space<vmem>>, %arg4: memref<8x128xf32, #tpu.memory_space<vmem>>) attributes {dimension_semantics = [#tpu.dimension_semantics<parallel>], iteration_bounds = array<i64: 2>, scalar_prefetch = 0 : i64, scratch_operands = 0 : i64, tpu.core_type = #tpu.core_type<tc>, window_params = [{transform_indices = @transform_0, window_bounds = array<i64: 8, 128>}, {pipeline_mode = #tpu.pipeline_mode<synchronous>, transform_indices = @transform_1, window_bounds = array<i64: 128, 128>}, {pipeline_mode = #tpu.pipeline_mode<synchronous>, transform_indices = @transform_2, window_bounds = array<i64: 1, 128>}, {transform_indices = @transform_3, window_bounds = array<i64: 8, 128>}]} {
    %c0 = arith.constant 0 : index
    %c0_0 = arith.constant 0 : index
    %0 = vector.load %arg1[%c0, %c0_0] : memref<8x128xf32, #tpu.memory_space<vmem>>, vector<8x128xf32>
    %c0_1 = arith.constant 0 : index
    %c0_2 = arith.constant 0 : index
    %1 = vector.load %arg2[%c0_1, %c0_2] : memref<128x128xf32, #tpu.memory_space<vmem>>, vector<128x128xf32>
    %cst = arith.constant dense<0.000000e+00> : vector<8x128xf32>
    %2 = tpu.matmul %0, %1, %cst {dimension_numbers = #tpu.dot_dimension_numbers<[1], [1], [0], [0], [0, 0, 1, 0], [], []>} : vector<8x128xf32>, vector<128x128xf32>, vector<8x128xf32> -> vector<8x128xf32>
    %c0_3 = arith.constant 0 : index
    %c0_4 = arith.constant 0 : index
    %3 = vector.load %arg3[%c0_3, %c0_4] : memref<1x128xf32, #tpu.memory_space<vmem>>, vector<1x128xf32>
    %4 = vector.broadcast %3 : vector<1x128xf32> to vector<8x128xf32>
    %5 = arith.addf %2, %4 : vector<8x128xf32>
    %cst_5 = arith.constant 0.000000e+00 : f32
    %6 = vector.broadcast %cst_5 : f32 to vector<8x128xf32>
    %7 = arith.maximumf %5, %6 : vector<8x128xf32>
    %c0_6 = arith.constant 0 : index
    %c0_7 = arith.constant 0 : index
    %8 = vector.load %arg4[%c0_6, %c0_7] : memref<8x128xf32, #tpu.memory_space<vmem>>, vector<8x128xf32>
    tpu.vector_store %arg4[%c0_6, %c0_7], %7 {strides = array<i32>} : memref<8x128xf32, #tpu.memory_space<vmem>>, vector<8x128xf32>,
    return
  }
  func.func @transform_0(%arg0: i32) -> (i32, i32) {
    %c0_i32 = arith.constant 0 : i32
    %c0_i32_0 = arith.constant 0 : i32
    return %arg0, %c0_i32 : i32, i32
  }
  func.func @transform_1(%arg0: i32) -> (i32, i32) {
    %c0_i32 = arith.constant 0 : i32
    %c0_i32_0 = arith.constant 0 : i32
    %c0_i32_1 = arith.constant 0 : i32
    return %c0_i32, %c0_i32_0 : i32, i32
  }
  func.func @transform_2(%arg0: i32) -> (i32, i32) {
    %c0_i32 = arith.constant 0 : i32
    %c0_i32_0 = arith.constant 0 : i32
    %c0_i32_1 = arith.constant 0 : i32
    return %c0_i32, %c0_i32_0 : i32, i32
  }
  func.func @transform_3(%arg0: i32) -> (i32, i32) {
    %c0_i32 = arith.constant 0 : i32
    %c0_i32_0 = arith.constant 0 : i32
    return %arg0, %c0_i32 : i32, i32
  }
}

</mosaic_0001>

<bundles_post_ra>
// kernel: tpu_custom_call.1
= control target key start
LH: loop header
LB: loop body
LE: loop exit
PB: predicated region body
PF: predicated region fallthrough
CT: control target
= control target key end

     0   :  { %8 = vsyncpa [#allocation3], 0  ;;  %s908_s0 = inlined_call_operand.hbm [shape: f32[16,128], index: 0, kind: input, shape index: {}]   ;;  %s909_s1 = inlined_call_operand.hbm [shape: f32[128,128], index: 1, kind: input, shape index: {}]   ;;  %s910_s2 = inlined_call_operand.vmem [shape: f32[1,128], index: 2, kind: input, shape index: {}]   ;;  %s911_s3 = inlined_call_operand.hbm [shape: f32[16,128], index: 3, kind: output, shape index: {}]  }
   0x1   :  { %10 = vsyncpa [#allocation3 + $0x1], 0 }
   0x2   :  { %11 = vsyncpa [#allocation6], 0 }
   0x3   :  { %12 = vsyncpa [#allocation4], 0 }
   0x4   :  { %14 = vsyncpa [#allocation4 + $0x1], 0  ;;  %s702_s12 = smov 0   ;;  %s704_s13 = smov 0  }
   0x5   :  { %s706_s14 = smov 0   ;;  %s708_s15 = smov 0  }
   0x6 LB: > { %s723_s16 = sadd.s32 4294967295, %s672_s15   ;;  %s391_s17 = sadd.s32 4294967294, %s672_s15   ;;  %s672_s15 = sphi %s708_s15, %s931_s15   ;;  %s668_s14 = sphi %s706_s14, %s930_s14   ;;  %s664_s13 = sphi %s704_s13, %s929_s13   ;;  %s660_s12 = sphi %s702_s12, %s928_s12  }
   0x7   : > { %p40_p0 = scmp.ne.s32.totalorder %s664_s13, %s660_s12  ;;  %p912_p1 = scmp.eq.s32.totalorder %s723_s16, 0 }
   0x8   : > { %p112_p3 = scmp.eq.s32.totalorder %s391_s17, 1  ;;  %p392_p5 = scmp.ge.s32.totalorder %s672_s15, 1 }
   0x9   : > { %p732_p4 = por %p912_p1, %p40_p0  ;;  %p119_p7 = scmp.lt.s32.totalorder %s672_s15, 3 }
   0xa   : > { %p737_p6 = por %p112_p3, %p40_p0  ;;  %s674_s21 = smov [#allocation5]  }
   0xb   : > { %s915_s18 = scalar_select %p732_p4, 1, 0 }
   0xc   : > { %s916_s19 = scalar_select %p737_p6, 1, 0 }
   0xd   : > { %p742_p8 = pnand %p392_p5, %p119_p7  ;;  %s131_s22 = sshll.u32 %s674_s21, 4  ;;  %s746_s22 = int_to_ptr.vmem [resolvable:$true] %s131_s22 }
   0xe   : > { %s758_s24 = sadd.s32 1, %s672_s15   ;;  %s27_s25 = sadd.s32 1, %s668_s14 }
   0xf   : > { %s917_s20 = scalar_select %p742_p8, 1, 0 }
  0x10   : > { %p490_p9 = pneg %p742_p8  ;;  %s24_s26 = ssub.s32 %s672_s15, %s758_s24 }
  0x11   : > { %s544_s29 = scalar_lea.hbm %s909_s1, 2048 }
  0x12   : > { %p753_p11 = pnand %p490_p9, %p912_p1  ;;  %p545_p12 = scmp.ne.s32.totalorder %s909_s1, %s544_s29 }
  0x13   : > { %p551_p5 = scmp.lt.u32.totalorder %s544_s29, %s909_s1 }
  0x14   : > { %p546_p13 = pneg %p753_p11 }
  0x16   : > { %p547_p0 = pnand %p546_p13, %p545_p12 }
  0x18   : > { %p548_p3 = pneg %p547_p0 }
  0x1a   : > { %p553_p7 = pnand %p551_p5, %p548_p3 }
  0x1c   : > { %556 = shalt.err (!%p553_p7)
}
  0x1d   : > { %s557_s7 = scalar_lea.vmem %s746_s22, 2048  ;;  %p565_p2 = scmp.lt.s32.totalorder %s746_s22, %s746_s22 }
  0x1e   : > { %p558_p9 = scmp.ne.s32.totalorder %s746_s22, %s557_s7  ;;  %p566_p6 = scmp.lt.s32.totalorder %s557_s7, %s557_s7 }
  0x20   : > { %p560_p10 = pnand %p558_p9, %p546_p13  ;;  %p567_p4 = por %p566_p6, %p565_p2 }
  0x22   : > { %p561_p1 = pneg %p560_p10 }
  0x24   : > { %p568_p8 = pnand %p567_p4, %p561_p1 }
  0x26   : > { %571 = shalt.err (!%p568_p8)
}
  0x27   : > { %s675_s8 = smov 128   ;;  %s676_s9 = smov 8  }
  0x28   : > { %493 = dma.hbm_to_vmem [thread:$0]  (!%p753_p11), %s909_s1, 2048, %s746_s22, [#allocation6], %s675_s8, %s675_s8, %s676_s9  }
  0x29   : > { %p25_p2 = scmp.eq.s32.totalorder %s24_s26, 0  ;;  %p34_p1 = scmp.ne.s32.totalorder %s668_s14, %s664_s13 }
  0x2a   : > { %p35_p4 = scmp.eq.s32.totalorder %s672_s15, 0  ;;  %p503_p6 = scmp.lt.s32.totalorder %s672_s15, 2 }
  0x2b   : > { %s789_s17 = scalar_select %p25_p2, %s668_s14, %s27_s25  }
  0x2c   : > { %p36_p8 = por %p35_p4, %p34_p1  ;;  %p919_p10 = scmp.eq.s32.totalorder %s723_s16, 1 }
  0x2d   : > { %s148_s27 = sand.u32 1, %s668_s14   ;;  %s396_s28 = sshll.u32 %s672_s15, 7 }
  0x2e   : > { %p793_p12 = por %p919_p10, %p34_p1  ;;  %s395_s29 = sshll.u32 %s148_s27, 3 }
  0x2f   : > { %s802_s4 = scalar_lea.hbm %s908_s0, %s396_s28  ;;  %s152_s22 = scalar_lea.vmem [#allocation2], %s395_s29 }
  0x30   : > { %s159_s25 = sshll.u32 %s152_s22, 4  ;;  %p804_p11 = pnand %p503_p6, %p36_p8  ;;  %s808_s25 = int_to_ptr.vmem [resolvable:$true] %s159_s25 }
  0x31   : > { %s149_s5 = scalar_lea.sflag [#allocation3], %s148_s27  ;;  %s572_s6 = scalar_lea.hbm %s802_s4, 128 }
  0x32   : > { %p573_p13 = scmp.ne.s32.totalorder %s802_s4, %s572_s6  ;;  %p574_p0 = pneg %p804_p11 }
  0x33   : > { %s577_s9 = scalar_lea.hbm %s908_s0, 256  ;;  %p578_p7 = scmp.lt.u32.totalorder %s802_s4, %s908_s0 }
  0x34   : > { %p575_p3 = pnand %p574_p0, %p573_p13  ;;  %p579_p9 = scmp.lt.u32.totalorder %s577_s9, %s572_s6 }
  0x35   : > { %p581_p1 = scmp.lt.u32.totalorder %s572_s6, %s802_s4 }
  0x36   : > { %p576_p5 = pneg %p575_p3  ;;  %p580_p2 = por %p579_p9, %p578_p7 }
  0x38   : > { %p582_p4 = por %p581_p1, %p580_p2 }
  0x3a   : > { %p583_p6 = pnand %p582_p4, %p576_p5 }
  0x3c   : > { %586 = shalt.err (!%p583_p6)
}
  0x3d   : > { %s587_s27 = scalar_lea.vmem %s808_s25, 128  ;;  %s677_s28 = smov [#allocation2]  }
  0x3e   : > { %p588_p8 = scmp.ne.s32.totalorder %s808_s25, %s587_s27  ;;  %s592_s29 = sshll.u32 %s677_s28, 4  ;;  %s593_s29 = int_to_ptr.vmem [resolvable:$false] %s592_s29 }
  0x3f   : > { %s594_s23 = scalar_lea.vmem %s593_s29, 256  ;;  %p595_p3 = scmp.lt.s32.totalorder %s808_s25, %s593_s29 }
  0x40   : > { %p590_p10 = pnand %p588_p8, %p574_p0  ;;  %p596_p7 = scmp.lt.s32.totalorder %s594_s23, %s587_s27 }
  0x42   : > { %p591_p13 = pneg %p590_p10  ;;  %p597_p9 = por %p596_p7, %p595_p3 }
  0x44   : > { %p598_p2 = pnand %p597_p9, %p591_p13 }
  0x46   : > { %601 = shalt.err (!%p598_p2)
}
  0x47   : > { %497 = dma.hbm_to_vmem [thread:$0]  (!%p804_p11), %s802_s4, 128, %s808_s25, %s149_s5  }
  0x48   : > { %p922_p5 = scmp.ne.s32.totalorder %s917_s20, 0 }
  0x49   : > { %s838_s30 = sand.u32 (!%p922_p5), 1, %s664_s13   ;;  %p923_p0 = scmp.ne.s32.totalorder (!%p922_p5), %s915_s18, 0 }
  0x4a   : > { %168 = sbr.rel (%p922_p5) target bundleno = 381 (0x17d), region = 32  ;;  %s398_s22 = sshll.u32 (!%p922_p5), %s838_s30, 3 }
  0x4b   : > { %s171_s6 = scalar_lea.sflag (!%p922_p5), [#allocation3], %s838_s30  ;;  %s844_s7 = scalar_lea.vmem (!%p922_p5), [#allocation2], %s398_s22 }
  0x51   : > { %647 = dma.done.wait (%p923_p0), %s171_s6, 128  }
  0x52   : > { %649 = vsyncadd (%p923_p0), %s171_s6, 4294967168  ;;  %p924_p11 = scmp.eq.s32.totalorder %s723_s16, 0 }
  0x54   : > { %651 = dma.done.wait (%p924_p11), [#allocation6], 2048   ;;  %p925_p1 = pmov %p924_p11 }
  0x55   : > { %v678_v0 = vmov 0.0|0.0   ;;  %vm679_vm0 = vmmov 0   ;;  %v680_v1 = vmov 0.0   ;;  %v202_v2 = vld [vmem:[#allocation5] sm:$0xff]  ;;  %v203_v3 = vld [vmem:[#allocation5 + $0x8] sm:$0xff]  ;;  %v204_v5 = vld [vmem:[#allocation5 + $0x10] sm:$0xff] }
  0x56   : > { %653 = vsyncadd (%p925_p1), [#allocation6], 4294965248  ;;  %458 = vmatprep.subr.bf16.mxu0 %v678_v0  ;;  %455 = vmatprep.mubr.msk.f32.mxu0 %vm679_vm0, %v680_v1  ;;  %v459_v4 = vpack.c.bf16 %v203_v3, %v202_v2  ;;  %v205_v6 = vld [vmem:[#allocation5 + $0x18] sm:$0xff]  ;;  %v206_v8 = vld [vmem:[#allocation5 + $0x20] sm:$0xff]  ;;  %s403_s4 = sshll.u32 %s723_s16, 7  ;;  %s200_s25 = scalar_lea.vmem [#allocation7], %s398_s22 }
  0x57   : > { %v462_v7 = vpack.c.bf16 %v205_v6, %v204_v5  ;;  %v207_v9 = vld [vmem:[#allocation5 + $0x28] sm:$0xff]  ;;  %v208_v11 = vld [vmem:[#allocation5 + $0x30] sm:$0xff]  ;;  %v209_v12 = vld [vmem:[#allocation5 + $0x38] sm:$0xff]  ;;  %s311_s26 = sshll.u32 %s200_s25, 4  ;;  %s864_s9 = scalar_lea.hbm %s911_s3, %s403_s4  ;;  %s866_s26 = int_to_ptr.vmem [resolvable:$true] %s311_s26 }
  0x58   : > { %460 = vmatpush3.bf16.xpose.msra.mxu0 %v459_v4  ;;  %v465_v10 = vpack.c.bf16 %v207_v9, %v206_v8  ;;  %v468_v13 = vpack.c.bf16 %v209_v12, %v208_v11  ;;  %v210_v14 = vld [vmem:[#allocation5 + $0x40] sm:$0xff]  ;;  %v211_v15 = vld [vmem:[#allocation5 + $0x48] sm:$0xff]  ;;  %v212_v17 = vld [vmem:[#allocation5 + $0x50] sm:$0xff]  ;;  %s298_s10 = scalar_lea.sflag [#allocation4], %s838_s30  ;;  %s602_s11 = scalar_lea.vmem %s866_s26, 128 }
  0x59   : > { %461 = vmatprep.subr.bf16.mxu0 %v678_v0  ;;  %v471_v16 = vpack.c.bf16 %v211_v15, %v210_v14  ;;  %v213_v18 = vld [vmem:[#allocation5 + $0x58] sm:$0xff]  ;;  %v214_v20 = vld [vmem:[#allocation5 + $0x60] sm:$0xff]  ;;  %v215_v21 = vld [vmem:[#allocation5 + $0x68] sm:$0xff]  ;;  %p603_p4 = scmp.ne.s32.totalorder %s866_s26, %s602_s11  ;;  %s681_s16 = smov [#allocation7]  }
  0x5a   : > { %v474_v19 = vpack.c.bf16 %v213_v18, %v212_v17  ;;  %v477_v22 = vpack.c.bf16 %v215_v21, %v214_v20  ;;  %v216_v23 = vld [vmem:[#allocation5 + $0x70] sm:$0xff]  ;;  %v217_v24 = vld [vmem:[#allocation5 + $0x78] sm:$0xff]  ;;  %s606_s27 = sshll.u32 %s681_s16, 4  ;;  %s607_s27 = int_to_ptr.vmem [resolvable:$false] %s606_s27 }
  0x5b   : > { %v480_v25 = vpack.c.bf16 %v217_v24, %v216_v23  ;;  %v201_v26 = vld [vmem:[%s844_s7] sm:$0xff]  ;;  %p604_p6 = pnand %p603_p4, %p793_p12  ;;  %s608_s28 = scalar_lea.vmem %s607_s27, 256 }
  0x5c   : > { %v401_v27 = vld [vmem:[%s910_s2] ss:$0 sm:$0xff]  ;;  %p609_p10 = scmp.lt.s32.totalorder %s866_s26, %s607_s27  ;;  %p610_p13 = scmp.lt.s32.totalorder %s608_s28, %s602_s11 }
  0x5d   : > { %p605_p8 = pneg %p604_p6 }
  0x5e   : > { %p611_p3 = por %p610_p13, %p609_p10 }
  0x60   : > { %463 = vmatpush3.bf16.xpose.msra.mxu0 %v462_v7  ;;  %p612_p7 = pnand %p611_p3, %p605_p8 }
  0x61   : > { %464 = vmatprep.subr.bf16.mxu0 %v678_v0 }
  0x68   : > { %466 = vmatpush3.bf16.xpose.msra.mxu0 %v465_v10 }
  0x69   : > { %467 = vmatprep.subr.bf16.mxu0 %v678_v0 }
  0x70   : > { %469 = vmatpush3.bf16.xpose.msra.mxu0 %v468_v13 }
  0x71   : > { %470 = vmatprep.subr.bf16.mxu0 %v678_v0 }
  0x78   : > { %472 = vmatpush3.bf16.xpose.msra.mxu0 %v471_v16 }
  0x79   : > { %473 = vmatprep.subr.bf16.mxu0 %v678_v0 }
  0x80   : > { %475 = vmatpush3.bf16.xpose.msra.mxu0 %v474_v19 }
  0x81   : > { %476 = vmatprep.subr.bf16.mxu0 %v678_v0 }
  0x88   : > { %478 = vmatpush3.bf16.xpose.msra.mxu0 %v477_v22 }
  0x89   : > { %479 = vmatprep.subr.bf16.mxu0 %v678_v0 }
  0x90   : > { %481 = vmatpush3.bf16.xpose.msra.mxu0 %v480_v25 }
  0x97   : > { %456 = vmatmul.mubr.f32.vlgmr.msra.gmra.mrb[0].mxu0 %v201_v26 }
 0x16a   : > { %v291_v28 = vpop.f32.mrb[0].mxu0 }
 0x16b   : > { %v292_v29 = vadd.f32 %v401_v27, %v291_v28  ;;  %v457_v30 = vpop.f32.mrb[1].mxu0 }
 0x16d   : > { %v295_v31 = vmax.f32 %v292_v29, 0.0 }
 0x16f   : > { %296 = vst [vmem:[%s200_s25] sm:$0xff] %v295_v31 }
 0x170   : > { %615 = shalt.err (!%p612_p7)
}
 0x171   : > { %s616_s29 = scalar_lea.hbm %s864_s9, 128  ;;  %s620_s22 = scalar_lea.hbm %s911_s3, 256 }
 0x172   : > { %p617_p9 = scmp.ne.s32.totalorder %s864_s9, %s616_s29  ;;  %p621_p0 = scmp.lt.u32.totalorder %s864_s9, %s911_s3 }
 0x173   : > { %p622_p11 = scmp.lt.u32.totalorder %s620_s22, %s616_s29  ;;  %p624_p4 = scmp.lt.u32.totalorder %s616_s29, %s864_s9 }
 0x174   : > { %p618_p2 = pnand %p617_p9, %p793_p12 }
 0x175   : > { %p623_p1 = por %p622_p11, %p621_p0 }
 0x176   : > { %p619_p5 = pneg %p618_p2 }
 0x177   : > { %p625_p6 = por %p624_p4, %p623_p1 }
 0x179   : > { %p626_p8 = pnand %p625_p6, %p619_p5 }
 0x17b   : > { %629 = shalt.err (!%p626_p8)
}
 0x17c   : > { %488 = dma.vmem_to_hbm [thread:$0]  (%p793_p12), %s866_s26, 128, %s864_s9, %s298_s10  }
 0x17d PF: > { %s323_s18 = sand.u32 1, %s660_s12   ;;  %p926_p10 = scmp.ne.s32.totalorder %s916_s19, 0 }
 0x17e   : > { %p927_p13 = scmp.ge.s32.totalorder %s672_s15, 2  ;;  %s324_s20 = scalar_lea.sflag [#allocation4], %s323_s18 }
 0x180   : > { %p499_p3 = pnand %p927_p13, %p926_p10 }
 0x182   : > { %655 = dma.done.wait (!%p499_p3), %s324_s20, 128  }
 0x183   : > { %657 = vsyncadd (!%p499_p3), %s324_s20, 4294967168  ;;  %p17_p7 = scmp.ge.s32.totalorder %s758_s24, 4   ;;  %s928_s12 = smov %s664_s13 }
 0x184   : > { %s929_s13 = smov %s668_s14  ;;  %s930_s14 = smov %s789_s17 }
 0x185   : > { %s931_s15 = smov %s758_s24  ;;  %19 = sbr.rel (!%p17_p7) target bundleno = 6 (0x6), region = 81 }
 0x18c   :  { %329 = vsyncpa [#allocation3], 1 }
 0x18d   :  { %331 = vsyncpa [#allocation3 + $0x1], 1 }
 0x18e   :  { %332 = vsyncpa [#allocation6], 1 }
 0x18f   :  { %333 = vsyncpa [#allocation4], 1 }
 0x190   :  { %335 = vsyncpa [#allocation4 + $0x1], 1 }

</bundles_post_ra>
